<compile_context>
chip_gen: v5e
topology: v5e:2x2
jax: 0.10.0
libtpu: 0.0.40
codegen_flags: <defaults>
</compile_context>

<pallas_src>
import jax
import jax.numpy as jnp
from jax.experimental import pallas as pl
from jax.experimental.pallas import tpu as pltpu


def _cnn_kernel(x_ref, w_ref, b_ref, o_ref):
    # x_ref: (B*L_pad, C*k)  im2col patches for one batch tile of B words
    # w_ref: (C*k, F_pad)    conv weight, filter dim zero-padded to 128 lanes
    # b_ref: (1, F_pad)      conv bias, zero-padded
    # o_ref: (B, F_pad)      max-pooled output for this batch tile
    bsz, f_pad = o_ref.shape
    l_pad = x_ref.shape[0] // bsz

    h = jnp.dot(x_ref[...], w_ref[...],
                preferred_element_type=jnp.float32)          # MXU: (B*L_pad, F_pad)
    h = jnp.maximum(h + b_ref[...], 0.0)                     # bias + ReLU (VPU)
    # Tile-aligned regroup (l_pad % 8 == 0, f_pad % 128 == 0), then max over the
    # word-length axis (sublane reduction on the XLU). One lane-dense store.
    o_ref[...] = jnp.max(h.reshape(bsz, l_pad, f_pad), axis=1)


def cnn_forward(x, weight, bias, k, *, words_per_block=256):
    """x: (N, C, L) float32; weight: (f, C, k); bias: (f,). Returns (N, f, 1)."""
    N, C, L = x.shape
    f = weight.shape[0]
    L_out = L - k + 1
    Ck = C * k

    # Alignment padding: sublane multiple for L_out, lane multiple for f.
    L_pad = pl.cdiv(L_out, 8) * 8
    F_pad = pl.cdiv(f, 128) * 128

    # Batch tile (multiple of 8 so the output block is sublane-aligned).
    B = pl.cdiv(min(words_per_block, N), 8) * 8
    n_blocks = pl.cdiv(N, B)
    N_pad = n_blocks * B

    # --- glue in plain JAX: im2col ---
    # x_col[b, t, c*k + j] = x[b, c, t + j]
    idx = jnp.arange(L_out)[:, None] + jnp.arange(k)[None, :]        # (L_out, k)
    x_col = x[:, :, idx]                                             # (N, C, L_out, k)
    x_col = jnp.transpose(x_col, (0, 2, 1, 3)).reshape(N, L_out, Ck)
    # Edge padding: duplicated patches produce duplicated conv outputs, which
    # cannot change the per-word max; padded batch rows are sliced off below.
    x_col = jnp.pad(x_col, ((0, N_pad - N), (0, L_pad - L_out), (0, 0)),
                    mode="edge")
    x2d = x_col.reshape(N_pad * L_pad, Ck)

    # w2d[c*k + j, o] = weight[o, c, j]; zero-pad filters/bias to F_pad.
    w2d = jnp.transpose(weight, (1, 2, 0)).reshape(Ck, f)
    w2d = jnp.pad(w2d, ((0, 0), (0, F_pad - f)))
    b2d = jnp.pad(bias, (0, F_pad - f)).reshape(1, F_pad)

    out = pl.pallas_call(
        _cnn_kernel,
        out_shape=jax.ShapeDtypeStruct((N_pad, F_pad), jnp.float32),
        grid=(n_blocks,),
        in_specs=[
            pl.BlockSpec((B * L_pad, Ck), lambda i: (i, 0)),
            pl.BlockSpec((Ck, F_pad), lambda i: (0, 0)),   # VMEM-resident weight
            pl.BlockSpec((1, F_pad), lambda i: (0, 0)),    # VMEM-resident bias
        ],
        out_specs=pl.BlockSpec((B, F_pad), lambda i: (i, 0)),
        compiler_params=pltpu.CompilerParams(
            dimension_semantics=("parallel",)),
    )(x2d, w2d, b2d)

    # Strip batch/filter padding; reshape to PyTorch NCL maxpool output (N, f, 1).
    return out[:N, :f].reshape(N, f, 1)


def cnn_reference(x, weight, bias, k):
    """Pure-JAX reference matching nn.Conv1d + ReLU + MaxPool1d."""
    conv = jax.lax.conv_general_dilated(
        x, weight, window_strides=(1,), padding="VALID",
        dimension_numbers=("NCH", "OIH", "NCH"))
    conv = conv + bias[None, :, None]
    h = jnp.maximum(conv, 0.0)
    return jnp.max(h, axis=-1, keepdims=True)


if __name__ == "__main__":
    # Small, deterministic config consistent with the module.
    embed_size = 32      # char embedding size (in_channels)
    f = 32               # number of filters (out_channels) = word embed size
    k = 5                # kernel size
    max_word_len = 21    # fixed inside the module
    N = 8                # batch (e.g. batch_size * sent_len flattened)

    key = jax.random.PRNGKey(0)
    kx, kw, kb = jax.random.split(key, 3)

    x = jax.random.normal(kx, (N, embed_size, max_word_len), dtype=jnp.float32)
    # Deterministic synthetic parameters (shapes match nn.Conv1d(embed_size, f, k)).
    bound = 1.0 / (embed_size * k) ** 0.5
    weight = jax.random.uniform(kw, (f, embed_size, k), jnp.float32, -bound, bound)
    bias = jax.random.uniform(kb, (f,), jnp.float32, -bound, bound)

    out = jax.block_until_ready(cnn_forward(x, weight, bias, k))
    ref = jax.block_until_ready(cnn_reference(x, weight, bias, k))
    assert out.shape == (N, f, 1), out.shape
    assert jnp.allclose(out, ref, atol=1e-5, rtol=1e-5), "mismatch vs reference"

    # Also exercise the batch-padding path (N not a multiple of the batch tile).
    x6 = x[:6]
    out6 = jax.block_until_ready(cnn_forward(x6, weight, bias, k))
    ref6 = jax.block_until_ready(cnn_reference(x6, weight, bias, k))
    assert out6.shape == (6, f, 1), out6.shape
    assert jnp.allclose(out6, ref6, atol=1e-5, rtol=1e-5), "mismatch (padded batch)"

    print("KERNEL_OK")
</pallas_src>

<mosaic_0001>
module attributes {stable_mosaic.version = 11 : i64} {
  func.func @_cnn_kernel(%arg0: i32, %arg1: memref<192x160xf32, #tpu.memory_space<vmem>>, %arg2: memref<160x128xf32, #tpu.memory_space<vmem>>, %arg3: memref<1x128xf32, #tpu.memory_space<vmem>>, %arg4: memref<8x128xf32, #tpu.memory_space<vmem>>) attributes {dimension_semantics = [#tpu.dimension_semantics<parallel>], iteration_bounds = array<i64: 1>, scalar_prefetch = 0 : i64, scratch_operands = 0 : i64, tpu.core_type = #tpu.core_type<tc>, window_params = [{transform_indices = @transform_0, window_bounds = array<i64: 192, 160>}, {pipeline_mode = #tpu.pipeline_mode<synchronous>, transform_indices = @transform_1, window_bounds = array<i64: 160, 128>}, {pipeline_mode = #tpu.pipeline_mode<synchronous>, transform_indices = @transform_2, window_bounds = array<i64: 1, 128>}, {transform_indices = @transform_3, window_bounds = array<i64: 8, 128>}]} {
    %c0 = arith.constant 0 : index
    %c0_0 = arith.constant 0 : index
    %0 = vector.load %arg1[%c0, %c0_0] : memref<192x160xf32, #tpu.memory_space<vmem>>, vector<192x160xf32>
    %c0_1 = arith.constant 0 : index
    %c0_2 = arith.constant 0 : index
    %1 = vector.load %arg2[%c0_1, %c0_2] : memref<160x128xf32, #tpu.memory_space<vmem>>, vector<160x128xf32>
    %cst = arith.constant dense<0.000000e+00> : vector<192x128xf32>
    %2 = tpu.matmul %0, %1, %cst {dimension_numbers = #tpu.dot_dimension_numbers<[1], [0], [0], [1], [0, 0, 1, 1], [], []>} : vector<192x160xf32>, vector<160x128xf32>, vector<192x128xf32> -> vector<192x128xf32>
    %c0_3 = arith.constant 0 : index
    %c0_4 = arith.constant 0 : index
    %3 = vector.load %arg3[%c0_3, %c0_4] : memref<1x128xf32, #tpu.memory_space<vmem>>, vector<1x128xf32>
    %4 = vector.broadcast %3 : vector<1x128xf32> to vector<192x128xf32>
    %5 = arith.addf %2, %4 : vector<192x128xf32>
    %cst_5 = arith.constant 0.000000e+00 : f32
    %6 = vector.broadcast %cst_5 : f32 to vector<192x128xf32>
    %7 = arith.maximumf %5, %6 : vector<192x128xf32>
    %8 = vector.shape_cast %7 : vector<192x128xf32> to vector<8x24x128xf32>
    %cst_6 = arith.constant dense<0xFF800000> : vector<8x128xf32>
    %9 = vector.multi_reduction <maximumf>, %8, %cst_6 [1] : vector<8x24x128xf32> to vector<8x128xf32>
    %c0_7 = arith.constant 0 : index
    %c0_8 = arith.constant 0 : index
    %10 = vector.load %arg4[%c0_7, %c0_8] : memref<8x128xf32, #tpu.memory_space<vmem>>, vector<8x128xf32>
    tpu.vector_store %arg4[%c0_7, %c0_8], %9 {strides = array<i32>} : memref<8x128xf32, #tpu.memory_space<vmem>>, vector<8x128xf32>,
    return
  }
  func.func @transform_0(%arg0: i32) -> (i32, i32) {
    %c0_i32 = arith.constant 0 : i32
    %c0_i32_0 = arith.constant 0 : i32
    return %arg0, %c0_i32 : i32, i32
  }
  func.func @transform_1(%arg0: i32) -> (i32, i32) {
    %c0_i32 = arith.constant 0 : i32
    %c0_i32_0 = arith.constant 0 : i32
    %c0_i32_1 = arith.constant 0 : i32
    return %c0_i32, %c0_i32_0 : i32, i32
  }
  func.func @transform_2(%arg0: i32) -> (i32, i32) {
    %c0_i32 = arith.constant 0 : i32
    %c0_i32_0 = arith.constant 0 : i32
    %c0_i32_1 = arith.constant 0 : i32
    return %c0_i32, %c0_i32_0 : i32, i32
  }
  func.func @transform_3(%arg0: i32) -> (i32, i32) {
    %c0_i32 = arith.constant 0 : i32
    %c0_i32_0 = arith.constant 0 : i32
    return %arg0, %c0_i32 : i32, i32
  }
}

</mosaic_0001>

<bundles_post_ra>
// kernel: tpu_custom_call.1
= control target key start
LH: loop header
LB: loop body
LE: loop exit
PB: predicated region body
PF: predicated region fallthrough
CT: control target
= control target key end

     0   :  { %vm87_vm0 = vcmask 261120   ;;  %s884_s0 = inlined_call_operand.vmem [shape: f32[192,160], index: 0, kind: input, shape index: {}]   ;;  %s885_s1 = inlined_call_operand.vmem [shape: f32[160,128], index: 1, kind: input, shape index: {}]   ;;  %s886_s2 = inlined_call_operand.vmem [shape: f32[1,128], index: 2, kind: input, shape index: {}]   ;;  %s887_s3 = inlined_call_operand.hbm [shape: f32[8,128], index: 3, kind: output, shape index: {}]  }
   0x1   :  { %v78_v0 = vld [vmem:[%s885_s1 + $0x78] sm:$0xff]  ;;  %v77_v2 = vld [vmem:[%s885_s1 + $0x70] sm:$0xff]  ;;  %v76_v4 = vld [vmem:[%s885_s1 + $0x68] sm:$0xff] }
   0x2   :  { %v581_v1 = vld [vmem:[%s885_s1 + $0x98] sm:$0xff]  ;;  %160 = vmatpush.msra.mxu0 %v78_v0  ;;  %490 = vmatpush.msra.mxu2 %v78_v0  ;;  %v589_v3 = vld [vmem:[%s885_s1 + $0x90] sm:$0xff]  ;;  %v598_v5 = vld [vmem:[%s885_s1 + $0x88] sm:$0xff] }
   0x3   :  { %491 = vmatpush.msra.mxu3 %v78_v0  ;;  %261 = vmatpush.msra.mxu1 %v581_v1  ;;  %v75_v6 = vld [vmem:[%s885_s1 + $0x60] sm:$0xff]  ;;  %v16_v8 = vld [vmem:[%s884_s0 + $0x8] sm:$0xff]  ;;  %v74_v9 = vld [vmem:[%s885_s1 + $0x58] sm:$0xff] }
   0x4   :  { %161 = vmatpush.msra.mxu0 %v77_v2  ;;  %492 = vmatpush.msra.mxu2 %v77_v2  ;;  %v607_v7 = vld [vmem:[%s885_s1 + $0x80] sm:$0xff]  ;;  %v73_v10 = vld [vmem:[%s885_s1 + $0x50] sm:$0xff]  ;;  %v72_v11 = vld [vmem:[%s885_s1 + $0x48] sm:$0xff] }
   0x5   :  { %493 = vmatpush.msra.mxu3 %v77_v2  ;;  %262 = vmatpush.msra.mxu1 %v589_v3 }
   0x6   :  { %162 = vmatpush.msra.mxu0 %v76_v4  ;;  %494 = vmatpush.msra.mxu2 %v76_v4 }
   0x7   :  { %495 = vmatpush.msra.mxu3 %v76_v4  ;;  %263 = vmatpush.msra.mxu1 %v598_v5 }
   0x8   :  { %163 = vmatpush.msra.mxu0 %v75_v6  ;;  %496 = vmatpush.msra.mxu2 %v75_v6 }
   0x9   :  { %497 = vmatpush.msra.mxu3 %v75_v6  ;;  %264 = vmatpush.msra.mxu1 %v607_v7 }
   0xa   :  { %466 = vmatmul.msk.f32.vlgmr.msra.gmra.mxu1 %vm87_vm0, %v16_v8  ;;  %164 = vmatpush.msra.mxu0 %v74_v9 }
   0xb   :  { %498 = vmatpush.msra.mxu2 %v74_v9  ;;  %499 = vmatpush.msra.mxu3 %v74_v9 }
   0xc   :  { %8 = vsyncpa [#allocation3], 0  ;;  %165 = vmatpush.msra.mxu0 %v73_v10  ;;  %v71_v12 = vld [vmem:[%s885_s1 + $0x40] sm:$0xff]  ;;  %v18_v13 = vld [vmem:[%s884_s0 + $0x18] sm:$0xff]  ;;  %vm434_vm1 = vcmask 1041409   ;;  %vm436_vm2 = vcmask 1042434  }
   0xd   :  { %500 = vmatpush.msra.mxu2 %v73_v10  ;;  %501 = vmatpush.msra.mxu3 %v73_v10  ;;  %v70_v14 = vld [vmem:[%s885_s1 + $0x38] sm:$0xff]  ;;  %v69_v15 = vld [vmem:[%s885_s1 + $0x30] sm:$0xff]  ;;  %v68_v16 = vld [vmem:[%s885_s1 + $0x28] sm:$0xff]  ;;  %vm438_vm3 = vcmask 1043459   ;;  %vm440_vm4 = vcmask 1044484   ;;  %vm442_vm5 = vcmask 1045509  }
   0xe   :  { %166 = vmatpush.msra.mxu0 %v72_v11  ;;  %v67_v17 = vld [vmem:[%s885_s1 + $0x20] sm:$0xff]  ;;  %v20_v18 = vld [vmem:[%s884_s0 + $0x28] sm:$0xff]  ;;  %v66_v19 = vld [vmem:[%s885_s1 + $0x18] sm:$0xff]  ;;  %vm444_vm6 = vcmask 1046534   ;;  %s457_s13 = sshll.u32 %s887_s3, 4  ;;  %vm446_vm7 = vcmask 1047559   ;;  %s458_s13 = int_to_ptr.hbm [resolvable:$true] %s457_s13 }
   0xf   :  { %502 = vmatpush.msra.mxu2 %v72_v11  ;;  %503 = vmatpush.msra.mxu3 %v72_v11  ;;  %v65_v20 = vld [vmem:[%s885_s1 + $0x10] sm:$0xff]  ;;  %v64_v21 = vld [vmem:[%s885_s1 + $0x8] sm:$0xff]  ;;  %v63_v22 = vld [vmem:[%s885_s1] sm:$0xff] }
  0x10   :  { %167 = vmatpush.msra.mxu0 %v71_v12  ;;  %v15_v23 = vld [vmem:[%s884_s0] sm:$0xff]  ;;  %v37_v24 = vld [vmem:[%s884_s0 + $0xb0] sm:$0xff]  ;;  %v22_v26 = vld [vmem:[%s884_s0 + $0x38] sm:$0xff] }
  0x11   :  { %504 = vmatpush.msra.mxu2 %v71_v12  ;;  %505 = vmatpush.msra.mxu3 %v71_v12  ;;  %v61_v25 = vld [vmem:[%s884_s0 + $0x170] sm:$0xff]  ;;  %v39_v28 = vld [vmem:[%s884_s0 + $0xc0] sm:$0xff]  ;;  %v24_v29 = vld [vmem:[%s884_s0 + $0x48] sm:$0xff] }
  0x12   :  { %467 = vmatmul.msk.f32.gmra.mxu1 %vm87_vm0, %v18_v13  ;;  %168 = vmatpush.msra.mxu0 %v70_v14  ;;  %v17_v27 = vld [vmem:[%s884_s0 + $0x10] sm:$0xff]  ;;  %v44_v30 = vld [vmem:[%s884_s0 + $0xe8] sm:$0xff]  ;;  %v19_v31 = vld [vmem:[%s884_s0 + $0x20] sm:$0xff] }
  0x13   :  { %506 = vmatpush.msra.mxu2 %v70_v14  ;;  %507 = vmatpush.msra.mxu3 %v70_v14  ;;  %v41_v32 = vld [vmem:[%s884_s0 + $0xd0] sm:$0xff]  ;;  %v26_v33 = vld [vmem:[%s884_s0 + $0x58] sm:$0xff]  ;;  %v43_v36 = vld [vmem:[%s884_s0 + $0xe0] sm:$0xff] }
  0x14   :  { %169 = vmatpush.msra.mxu0 %v69_v15  ;;  %v46_v34 = vld [vmem:[%s884_s0 + $0xf8] sm:$0xff]  ;;  %v21_v35 = vld [vmem:[%s884_s0 + $0x30] sm:$0xff]  ;;  %v28_v37 = vld [vmem:[%s884_s0 + $0x68] sm:$0xff] }
  0x15   :  { %508 = vmatpush.msra.mxu2 %v69_v15  ;;  %509 = vmatpush.msra.mxu3 %v69_v15  ;;  %v48_v38 = vld [vmem:[%s884_s0 + $0x108] sm:$0xff]  ;;  %v23_v39 = vld [vmem:[%s884_s0 + $0x40] sm:$0xff]  ;;  %v45_v40 = vld [vmem:[%s884_s0 + $0xf0] sm:$0xff] }
  0x16   :  { %170 = vmatpush.msra.mxu0 %v68_v16  ;;  %v30_v41 = vld [vmem:[%s884_s0 + $0x78] sm:$0xff]  ;;  %v25_v43 = vld [vmem:[%s884_s0 + $0x50] sm:$0xff]  ;;  %v47_v44 = vld [vmem:[%s884_s0 + $0x100] sm:$0xff] }
  0x17   :  { %510 = vmatpush.msra.mxu2 %v68_v16  ;;  %511 = vmatpush.msra.mxu3 %v68_v16  ;;  %v50_v42 = vld [vmem:[%s884_s0 + $0x118] sm:$0xff]  ;;  %v32_v45 = vld [vmem:[%s884_s0 + $0x88] sm:$0xff]  ;;  %v27_v47 = vld [vmem:[%s884_s0 + $0x60] sm:$0xff] }
  0x18   :  { %171 = vmatpush.msra.mxu0 %v67_v17  ;;  %v52_v46 = vld [vmem:[%s884_s0 + $0x128] sm:$0xff]  ;;  %v49_v48 = vld [vmem:[%s884_s0 + $0x110] sm:$0xff]  ;;  %v34_v49 = vld [vmem:[%s884_s0 + $0x98] sm:$0xff] }
  0x19   :  { %512 = vmatpush.msra.mxu2 %v67_v17  ;;  %513 = vmatpush.msra.mxu3 %v67_v17  ;;  %v54_v50 = vld [vmem:[%s884_s0 + $0x138] sm:$0xff]  ;;  %v29_v51 = vld [vmem:[%s884_s0 + $0x70] sm:$0xff]  ;;  %v51_v52 = vld [vmem:[%s884_s0 + $0x120] sm:$0xff] }
  0x1a   :  { %468 = vmatmul.msk.f32.gmra.mxu1 %vm87_vm0, %v20_v18  ;;  %172 = vmatpush.msra.mxu0 %v66_v19  ;;  %v36_v53 = vld [vmem:[%s884_s0 + $0xa8] sm:$0xff]  ;;  %v31_v55 = vld [vmem:[%s884_s0 + $0x80] sm:$0xff]  ;;  %v53_v56 = vld [vmem:[%s884_s0 + $0x130] sm:$0xff] }
  0x1b   :  { %514 = vmatpush.msra.mxu2 %v66_v19  ;;  %515 = vmatpush.msra.mxu3 %v66_v19  ;;  %v56_v54 = vld [vmem:[%s884_s0 + $0x148] sm:$0xff]  ;;  %v38_v57 = vld [vmem:[%s884_s0 + $0xb8] sm:$0xff]  ;;  %v33_v59 = vld [vmem:[%s884_s0 + $0x90] sm:$0xff] }
  0x1c   :  { %173 = vmatpush.msra.mxu0 %v65_v20  ;;  %v58_v58 = vld [vmem:[%s884_s0 + $0x158] sm:$0xff]  ;;  %v55_v60 = vld [vmem:[%s884_s0 + $0x140] sm:$0xff]  ;;  %v40_v61 = vld [vmem:[%s884_s0 + $0xc8] sm:$0xff] }
  0x1d   :  { %516 = vmatpush.msra.mxu2 %v65_v20  ;;  %517 = vmatpush.msra.mxu3 %v65_v20  ;;  %v60_v62 = vld [vmem:[%s884_s0 + $0x168] sm:$0xff]  ;;  %v35_v63 = vld [vmem:[%s884_s0 + $0xa0] sm:$0xff]  ;;  %v57_v0 = vld [vmem:[%s884_s0 + $0x150] sm:$0xff] }
  0x1e   :  { %174 = vmatpush.msra.mxu0 %v64_v21  ;;  %v62_v2 = vld [vmem:[%s884_s0 + $0x178] sm:$0xff] }
  0x1f   :  { %518 = vmatpush.msra.mxu2 %v64_v21  ;;  %519 = vmatpush.msra.mxu3 %v64_v21 }
  0x20   :  { %175 = vmatpush.msra.mxu0 %v63_v22 }
  0x21   :  { %520 = vmatpush.msra.mxu2 %v63_v22  ;;  %521 = vmatpush.msra.mxu3 %v63_v22 }
  0x22   :  { %176 = vmatmul.f32.vlgmr.msra.gmra.mxu0 %v15_v23  ;;  %209 = vmatmul.f32.vlgmr.msra.gmra.mxu2 %v37_v24 }
  0x23   :  { %245 = vmatmul.f32.vlgmr.msra.gmra.mxu3 %v61_v25  ;;  %469 = vmatmul.msk.f32.gmra.mxu1 %vm87_vm0, %v22_v26 }
  0x24   :  { %522 = vmatpush.msrb.mxu3 %v581_v1  ;;  %v42_v1 = vld [vmem:[%s884_s0 + $0xd8] sm:$0xff] }
  0x26   :  { %523 = vmatpush.msrb.mxu3 %v589_v3  ;;  %v59_v3 = vld [vmem:[%s884_s0 + $0x160] sm:$0xff]  ;;  %s554_s0 = smov [#allocation2]  }
  0x28   :  { %524 = vmatpush.msrb.mxu3 %v598_v5 }
  0x2a   :  { %525 = vmatpush.msrb.mxu3 %v607_v7  ;;  %179 = vmatmul.f32.gmra.mxu0 %v17_v27  ;;  %v822_v7 = vld [vmem:[%s886_s2] ss:$0 sm:$0xff]  ;;  %s455_s2 = sshll.u32 %s554_s0, 4  ;;  %s456_s2 = int_to_ptr.vmem [resolvable:$true] %s455_s2 }
  0x2b   :  { %212 = vmatmul.f32.gmra.mxu2 %v39_v28  ;;  %470 = vmatmul.msk.f32.gmra.mxu1 %vm87_vm0, %v24_v29 }
  0x2c   :  { %480 = vmatmul.msk.f32.vlgmr.msrb.gmra.mxu3 %vm87_vm0, %v44_v30 }
  0x32   :  { %182 = vmatmul.f32.gmra.mxu0 %v19_v31 }
  0x33   :  { %215 = vmatmul.f32.gmra.mxu2 %v41_v32  ;;  %471 = vmatmul.msk.f32.gmra.mxu1 %vm87_vm0, %v26_v33 }
  0x34   :  { %481 = vmatmul.msk.f32.gmra.mxu3 %vm87_vm0, %v46_v34 }
  0x3a   :  { %185 = vmatmul.f32.gmra.mxu0 %v21_v35 }
  0x3b   :  { %218 = vmatmul.f32.gmra.mxu2 %v43_v36  ;;  %472 = vmatmul.msk.f32.gmra.mxu1 %vm87_vm0, %v28_v37 }
  0x3c   :  { %482 = vmatmul.msk.f32.gmra.mxu3 %vm87_vm0, %v48_v38 }
  0x42   :  { %188 = vmatmul.f32.gmra.mxu0 %v23_v39 }
  0x43   :  { %221 = vmatmul.f32.gmra.mxu2 %v45_v40  ;;  %473 = vmatmul.msk.f32.gmra.mxu1 %vm87_vm0, %v30_v41 }
  0x44   :  { %483 = vmatmul.msk.f32.gmra.mxu3 %vm87_vm0, %v50_v42 }
  0x4a   :  { %191 = vmatmul.f32.gmra.mxu0 %v25_v43 }
  0x4b   :  { %224 = vmatmul.f32.gmra.mxu2 %v47_v44  ;;  %474 = vmatmul.msk.f32.gmra.mxu1 %vm87_vm0, %v32_v45 }
  0x4c   :  { %484 = vmatmul.msk.f32.gmra.mxu3 %vm87_vm0, %v52_v46 }
  0x52   :  { %194 = vmatmul.f32.gmra.mxu0 %v27_v47 }
  0x53   :  { %227 = vmatmul.f32.gmra.mxu2 %v49_v48  ;;  %475 = vmatmul.msk.f32.gmra.mxu1 %vm87_vm0, %v34_v49 }
  0x54   :  { %485 = vmatmul.msk.f32.gmra.mxu3 %vm87_vm0, %v54_v50 }
  0x5a   :  { %197 = vmatmul.f32.gmra.mxu0 %v29_v51 }
  0x5b   :  { %230 = vmatmul.f32.gmra.mxu2 %v51_v52  ;;  %476 = vmatmul.msk.f32.gmra.mxu1 %vm87_vm0, %v36_v53 }
  0x5c   :  { %486 = vmatmul.msk.f32.gmra.mxu3 %vm87_vm0, %v56_v54 }
  0x62   :  { %200 = vmatmul.f32.gmra.mxu0 %v31_v55 }
  0x63   :  { %233 = vmatmul.f32.gmra.mxu2 %v53_v56  ;;  %477 = vmatmul.msk.f32.gmra.mxu1 %vm87_vm0, %v38_v57 }
  0x64   :  { %487 = vmatmul.msk.f32.gmra.mxu3 %vm87_vm0, %v58_v58 }
  0x6a   :  { %203 = vmatmul.f32.gmra.mxu0 %v33_v59 }
  0x6b   :  { %236 = vmatmul.f32.gmra.mxu2 %v55_v60  ;;  %478 = vmatmul.msk.f32.gmra.mxu1 %vm87_vm0, %v40_v61 }
  0x6c   :  { %488 = vmatmul.msk.f32.gmra.mxu3 %vm87_vm0, %v60_v62 }
  0x72   :  { %206 = vmatmul.f32.gmra.mxu0 %v35_v63 }
  0x73   :  { %239 = vmatmul.f32.gmra.mxu2 %v57_v0  ;;  %479 = vmatmul.msk.f32.gmra.mxu1 %vm87_vm0, %v42_v1 }
  0x74   :  { %489 = vmatmul.msk.f32.gmra.mxu3 %vm87_vm0, %v62_v2 }
  0x7b   :  { %242 = vmatmul.f32.gmra.mxu2 %v59_v3 }
  0x87   :  { %v266_v4 = vpop.f32.mrf.mxu1 }
  0x8f   :  { %v269_v5 = vpop.f32.mrf.mxu1 }
  0x97   :  { %v272_v6 = vpop.f32.mrf.mxu1 }
  0x9f   :  { %v177_v8 = vpop.f32.mrf.mxu0 }
  0xa0   :  { %v178_v9 = vadd.f32 %v822_v7, %v177_v8  ;;  %v275_v10 = vpop.f32.mrf.mxu1 }
  0xa2   :  { %v267_v11 = vadd.f32 %v266_v4, %v178_v9 }
  0xa4   :  { %v338_v18 = vmax.f32 %v267_v11, 0.0 }
  0xa5   :  { %v825_v12 = vpop.f32.mrf.mxu2 }
  0xa6   :  { %v827_v13 = vpop.f32.mrf.mxu3 }
  0xa7   :  { %v180_v14 = vpop.f32.mrf.mxu0 }
  0xa8   :  { %v181_v15 = vadd.f32 %v822_v7, %v180_v14  ;;  %v278_v16 = vpop.f32.mrf.mxu1 }
  0xaa   :  { %v270_v17 = vadd.f32 %v269_v5, %v181_v15 }
  0xac   :  { %v339_v19 = vmax.f32 %v270_v17, 0.0 }
  0xae   :  { %v362_v20 = vmax.f32 %v338_v18, %v339_v19  ;;  %v830_v21 = vpop.f32.mrf.mxu2 }
  0xaf   :  { %v832_v22 = vpop.f32.mrf.mxu3  ;;  %v183_v23 = vpop.f32.mrf.mxu0 }
  0xb0   :  { %v184_v24 = vadd.f32 %v822_v7, %v183_v23  ;;  %v281_v25 = vpop.f32.mrf.mxu1 }
  0xb2   :  { %v273_v26 = vadd.f32 %v272_v6, %v184_v24 }
  0xb4   :  { %v340_v27 = vmax.f32 %v273_v26, 0.0 }
  0xb6   :  { %v363_v28 = vmax.f32 %v362_v20, %v340_v27  ;;  %v835_v29 = vpop.f32.mrf.mxu2 }
  0xb7   :  { %v837_v30 = vpop.f32.mrf.mxu3  ;;  %v186_v31 = vpop.f32.mrf.mxu0 }
  0xb8   :  { %v284_v32 = vpop.f32.mrf.mxu1  ;;  %v187_v33 = vadd.f32 %v822_v7, %v186_v31  ;;  %v364_v43 = vrot.slane %v363_v28, 4 }
  0xba   :  { %v276_v37 = vadd.f32 %v275_v10, %v187_v33  ;;  %v365_v50 = vmax.f32 %v363_v28, %v364_v43 }
  0xbc   :  { %v341_v41 = vmax.f32 %v276_v37, 0.0  ;;  %v366_v53 = vrot.slane %v365_v50, 2 }
  0xbe   :  { %v840_v34 = vpop.f32.mrf.mxu2  ;;  %v367_v60 = vmax.f32 %v365_v50, %v366_v53 }
  0xbf   :  { %v842_v35 = vpop.f32.mrf.mxu3  ;;  %v189_v36 = vpop.f32.mrf.mxu0  ;;  %v220_v43 = vadd.f32 %v822_v7, %v840_v34 }
  0xc0   :  { %v190_v38 = vadd.f32 %v822_v7, %v189_v36  ;;  %v287_v39 = vpop.f32.mrf.mxu1  ;;  %v368_v63 = vrot.slane %v367_v60, 1 }
  0xc2   :  { %v279_v40 = vadd.f32 %v278_v16, %v190_v38  ;;  %v369_v6 = vmax.f32 %v367_v60, %v368_v63 }
  0xc4   :  { %v342_v42 = vmax.f32 %v279_v40, 0.0 }
  0xc6   :  { %v370_v44 = vmax.f32 %v341_v41, %v342_v42  ;;  %v222_v45 = vpop.f32.mrf.mxu2  ;;  %v214_v42 = vadd.f32 %v822_v7, %v830_v21  ;;  %v211_v21 = vadd.f32 %v822_v7, %v825_v12 }
  0xc7   :  { %v317_v46 = vpop.f32.mrf.mxu3  ;;  %v192_v47 = vpop.f32.mrf.mxu0 }
  0xc8   :  { %v193_v48 = vadd.f32 %v822_v7, %v192_v47  ;;  %v290_v49 = vpop.f32.mrf.mxu1 }
  0xca   :  { %v282_v51 = vadd.f32 %v281_v25, %v193_v48  ;;  %v217_v48 = vadd.f32 %v822_v7, %v835_v29  ;;  %v309_v29 = vadd.f32 %v832_v22, %v220_v43 }
  0xcc   :  { %v343_v52 = vmax.f32 %v282_v51, 0.0 }
  0xce   :  { %v371_v54 = vmax.f32 %v370_v44, %v343_v52  ;;  %v225_v55 = vpop.f32.mrf.mxu2 }
  0xcf   :  { %v846_v56 = vpop.f32.mrf.mxu3  ;;  %v195_v57 = vpop.f32.mrf.mxu0  ;;  %v226_v36 = vadd.f32 %v822_v7, %v225_v55 }
  0xd0   :  { %v372_v58 = vrot.slane %v371_v54, 4  ;;  %v293_v59 = vpop.f32.mrf.mxu1  ;;  %v196_v11 = vadd.f32 %v822_v7, %v195_v57 }
  0xd1   :  { %v315_v44 = vadd.f32 %v842_v35, %v226_v36 }
  0xd2   :  { %v373_v61 = vmax.f32 %v371_v54, %v372_v58  ;;  %v285_v20 = vadd.f32 %v284_v32, %v196_v11 }
  0xd3   :  { %v354_v58 = vmax.f32 %v315_v44, 0.0 }
  0xd4   :  { %v374_v62 = vrot.slane %v373_v61, 2  ;;  %v344_v25 = vmax.f32 %v285_v20, 0.0 }
  0xd6   :  { %v375_v0 = vmax.f32 %v373_v61, %v374_v62  ;;  %v228_v1 = vpop.f32.mrf.mxu2 }
  0xd7   :  { %v323_v2 = vpop.f32.mrf.mxu3  ;;  %v198_v3 = vpop.f32.mrf.mxu0  ;;  %v229_v40 = vadd.f32 %v822_v7, %v228_v1 }
  0xd8   :  { %v376_v4 = vrot.slane %v375_v0, 1  ;;  %v296_v5 = vpop.f32.mrf.mxu1  ;;  %v199_v9 = vadd.f32 %v822_v7, %v198_v3 }
  0xd9   :  { %v318_v51 = vadd.f32 %v317_v46, %v229_v40 }
  0xda   :  { %v377_v8 = vmax.f32 %v375_v0, %v376_v4  ;;  %v288_v15 = vadd.f32 %v287_v39, %v199_v9  ;;  %v223_v39 = vadd.f32 %v822_v7, %v222_v45 }
  0xdb   :  { %v355_v1 = vmax.f32 %v318_v51, 0.0 }
  0xdc   :  { %v849_v10 = vsel %vm434_vm1, %v377_v8, %v369_v6  ;;  %v345_v24 = vmax.f32 %v288_v15, 0.0  ;;  %v312_v50 = vadd.f32 %v837_v30, %v223_v39  ;;  %v352_v8 = vmax.f32 %v309_v29, 0.0 }
  0xdd   :  { %v247_v39 = vadd.f32 %v822_v7, %v827_v13 }
  0xde   :  { %v231_v14 = vpop.f32.mrf.mxu2  ;;  %v378_v28 = vmax.f32 %v344_v25, %v345_v24  ;;  %v353_v0 = vmax.f32 %v312_v50, 0.0 }
  0xdf   :  { %v201_v16 = vpop.f32.mrf.mxu0  ;;  %v326_v17 = vpop.f32.mrf.mxu3  ;;  %v232_v45 = vadd.f32 %v822_v7, %v231_v14 }
  0xe0   :  { %v202_v18 = vadd.f32 %v822_v7, %v201_v16  ;;  %v299_v19 = vpop.f32.mrf.mxu1  ;;  %v402_v9 = vmax.f32 %v353_v0, %v354_v58 }
  0xe1   :  { %v321_v30 = vadd.f32 %v846_v56, %v232_v45  ;;  %v300_v46 = vadd.f32 %v299_v19, %v211_v21 }
  0xe2   :  { %v291_v23 = vadd.f32 %v290_v49, %v202_v18  ;;  %v403_v19 = vmax.f32 %v402_v9, %v355_v1 }
  0xe3   :  { %v356_v14 = vmax.f32 %v321_v30, 0.0  ;;  %v349_v15 = vmax.f32 %v300_v46, 0.0 }
  0xe4   :  { %v346_v26 = vmax.f32 %v291_v23, 0.0 }
  0xe6   :  { %v234_v27 = vpop.f32.mrf.mxu2  ;;  %v379_v37 = vmax.f32 %v378_v28, %v346_v26 }
  0xe7   :  { %v204_v31 = vpop.f32.mrf.mxu0  ;;  %v854_v38 = vpop.f32.mrf.mxu3  ;;  %v235_v41 = vadd.f32 %v822_v7, %v234_v27  ;;  %v404_v27 = vrot.slane %v403_v19, 4 }
  0xe8   :  { %v302_v33 = vpop.f32.mrf.mxu1  ;;  %v205_v32 = vadd.f32 %v822_v7, %v204_v31  ;;  %v380_v47 = vrot.slane %v379_v37, 4 }
  0xe9   :  { %v303_v52 = vadd.f32 %v302_v33, %v214_v42  ;;  %v324_v34 = vadd.f32 %v323_v2, %v235_v41  ;;  %v405_v43 = vmax.f32 %v403_v19, %v404_v27 }
  0xea   :  { %v294_v55 = vadd.f32 %v293_v59, %v205_v32  ;;  %v381_v60 = vmax.f32 %v379_v37, %v380_v47 }
  0xeb   :  { %v350_v3 = vmax.f32 %v303_v52, 0.0  ;;  %v357_v12 = vmax.f32 %v324_v34, 0.0  ;;  %v406_v21 = vrot.slane %v405_v43, 2 }
  0xec   :  { %v347_v2 = vmax.f32 %v294_v55, 0.0  ;;  %v382_v11 = vrot.slane %v381_v60, 2 }
  0xee   :  { %v237_v49 = vpop.f32.mrf.mxu2  ;;  %v383_v23 = vmax.f32 %v381_v60, %v382_v11  ;;  %v407_v60 = vmax.f32 %v405_v43, %v406_v21 }
  0xef   :  { %v238_v53 = vadd.f32 %v822_v7, %v237_v49  ;;  %v207_v54 = vpop.f32.mrf.mxu0  ;;  %v332_v59 = vpop.f32.mrf.mxu3 }
  0xf0   :  { %v208_v35 = vadd.f32 %v822_v7, %v207_v54  ;;  %v305_v57 = vpop.f32.mrf.mxu1  ;;  %v384_v36 = vrot.slane %v383_v23, 1 }
  0xf1   :  { %v306_v61 = vadd.f32 %v305_v57, %v217_v48  ;;  %v327_v62 = vadd.f32 %v326_v17, %v238_v53 }
  0xf2   :  { %v297_v63 = vadd.f32 %v296_v5, %v208_v35  ;;  %v410_v5 = vmax.f32 %v356_v14, %v357_v12  ;;  %v385_v49 = vmax.f32 %v383_v23, %v384_v36 }
  0xf3   :  { %v351_v4 = vmax.f32 %v306_v61, 0.0  ;;  %v358_v16 = vmax.f32 %v327_v62, 0.0 }
  0xf4   :  { %v348_v6 = vmax.f32 %v297_v63, 0.0  ;;  %v408_v63 = vrot.slane %v407_v60, 1 }
  0xf5   :  { %v394_v22 = vmax.f32 %v350_v3, %v351_v4  ;;  %v411_v25 = vmax.f32 %v410_v5, %v358_v16 }
  0xf6   :  { %v386_v18 = vmax.f32 %v347_v2, %v348_v6  ;;  %v240_v56 = vpop.f32.mrf.mxu2  ;;  %v409_v4 = vmax.f32 %v407_v60, %v408_v63 }
  0xf7   :  { %v395_v17 = vmax.f32 %v394_v22, %v352_v8  ;;  %v241_v31 = vadd.f32 %v822_v7, %v240_v56  ;;  %v412_v40 = vrot.slane %v411_v25, 4  ;;  %v335_v32 = vpop.f32.mrf.mxu3 }
  0xf8   :  { %v387_v20 = vmax.f32 %v386_v18, %v349_v15  ;;  %v336_v51 = vadd.f32 %v335_v32, %v247_v39 }
  0xf9   :  { %v396_v24 = vrot.slane %v395_v17, 4  ;;  %v330_v47 = vadd.f32 %v854_v38, %v241_v31  ;;  %v413_v53 = vmax.f32 %v411_v25, %v412_v40  ;;  %v437_v38 = vsel %vm436_vm2, %v385_v49, %v849_v10 }
  0xfa   :  { %v388_v26 = vrot.slane %v387_v20, 4  ;;  %v361_v57 = vmax.f32 %v336_v51, 0.0 }
  0xfb   :  { %v397_v28 = vmax.f32 %v395_v17, %v396_v24  ;;  %v359_v13 = vmax.f32 %v330_v47, 0.0 }
  0xfc   :  { %v389_v33 = vmax.f32 %v387_v20, %v388_v26 }
  0xfd   :  { %v398_v37 = vrot.slane %v397_v28, 2 }
  0xfe   :  { %v390_v41 = vrot.slane %v389_v33, 2  ;;  %v243_v42 = vpop.f32.mrf.mxu2 }
  0xff   :  { %v399_v44 = vmax.f32 %v397_v28, %v398_v37  ;;  %v244_v48 = vadd.f32 %v822_v7, %v243_v42  ;;  %v414_v7 = vrot.slane %v413_v53, 2 }
 0x100   :  { %v391_v45 = vmax.f32 %v389_v33, %v390_v41 }
 0x101   :  { %v400_v50 = vrot.slane %v399_v44, 1  ;;  %v333_v52 = vadd.f32 %v332_v59, %v244_v48  ;;  %v415_v62 = vmax.f32 %v413_v53, %v414_v7 }
 0x102   :  { %v392_v54 = vrot.slane %v391_v45, 1 }
 0x103   :  { %v360_v34 = vmax.f32 %v333_v52, 0.0  ;;  %v401_v35 = vmax.f32 %v399_v44, %v400_v50  ;;  %v416_v3 = vrot.slane %v415_v62, 1 }
 0x104   :  { %v393_v55 = vmax.f32 %v391_v45, %v392_v54 }
 0x105   :  { %v418_v29 = vmax.f32 %v359_v13, %v360_v34  ;;  %v417_v10 = vmax.f32 %v415_v62, %v416_v3 }
 0x106   :  { %v439_v58 = vsel %vm438_vm3, %v393_v55, %v437_v38 }
 0x107   :  { %v419_v61 = vmax.f32 %v418_v29, %v361_v57  ;;  %v441_v30 = vsel %vm440_vm4, %v401_v35, %v439_v58 }
 0x108   :  { %v443_v59 = vsel %vm442_vm5, %v409_v4, %v441_v30 }
 0x109   :  { %v420_v46 = vrot.slane %v419_v61, 4  ;;  %v445_v8 = vsel %vm444_vm6, %v417_v10, %v443_v59 }
 0x10b   :  { %v421_v0 = vmax.f32 %v419_v61, %v420_v46 }
 0x10d   :  { %v422_v1 = vrot.slane %v421_v0, 2 }
 0x10f   :  { %v423_v12 = vmax.f32 %v421_v0, %v422_v1 }
 0x111   :  { %v424_v2 = vrot.slane %v423_v12, 1 }
 0x113   :  { %v425_v6 = vmax.f32 %v423_v12, %v424_v2 }
 0x115   :  { %v447_v9 = vsel %vm446_vm7, %v425_v6, %v445_v8 }
 0x116   :  { %449 = vst [vmem:[#allocation2] sm:$0xff] %v447_v9 }
 0x117   :  { %460 = dma.vmem_to_hbm [thread:$0]  %s456_s2, 128, %s458_s13, [#allocation3]  }
 0x118   :  { %552 = dma.done.wait [#allocation3], 128  }
 0x119   :  { %553 = vsyncadd [#allocation3], 4294967168 }
 0x11a   :  { %465 = vsyncpa [#allocation3], 1 }

</bundles_post_ra>
